<compile_context>
chip_gen: v7x
topology: tpu7x:2x2x1
jax: 0.10.0
libtpu: 0.0.40
codegen_flags: <defaults>
</compile_context>

<pallas_src>
import jax
import jax.numpy as jnp
from jax.experimental import pallas as pl
from jax.experimental.pallas import tpu as pltpu

INPUT_SIZE = 15
HIDDEN1 = 128
HIDDEN2 = 64
NUM_CLASSES = 7

SUBLANE = 8

IN_PAD = 16   # 15 -> 16 lanes (one zero lane; keeps w1 sublane dim a multiple of 8)
OUT_PAD = 8   # 7  -> 8 lanes  (one pad lane; logits in [:, :NUM_CLASSES])


# ----------------------------------------------------------------------------
# Fused kernel: Linear -> ReLU -> Linear -> ReLU -> Linear, all resident in VMEM
# ----------------------------------------------------------------------------
def _fused_mlp_kernel(x_ref, w1_ref, b1_ref, w2_ref, b2_ref, w3_ref, b3_ref, o_ref):
    # x_ref : (TM, IN_PAD)         zero-padded input rows/lanes
    # w1    : (IN_PAD, HIDDEN1)    b1: (1, HIDDEN1)
    # w2    : (HIDDEN1, HIDDEN2)   b2: (1, HIDDEN2)
    # w3    : (HIDDEN2, OUT_PAD)   b3: (1, OUT_PAD)
    # o_ref : (TM, OUT_PAD)        logits in [:, :NUM_CLASSES]
    h = jnp.dot(x_ref[...], w1_ref[...], preferred_element_type=jnp.float32) + b1_ref[...]
    h = jnp.maximum(h, 0.0)
    h = jnp.dot(h, w2_ref[...], preferred_element_type=jnp.float32) + b2_ref[...]
    h = jnp.maximum(h, 0.0)
    o_ref[...] = jnp.dot(h, w3_ref[...], preferred_element_type=jnp.float32) + b3_ref[...]


def mlp_forward(x, params, *, row_tile=1024):
    """x: (B, INPUT_SIZE) float32 -> logits (B, NUM_CLASSES) float32."""
    w1, b1, w2, b2, w3, b3 = params
    B = x.shape[0]

    # Rows padded to a sublane multiple; tile capped at row_tile (default 1024:
    # the kernel is per-step-overhead bound, so bigger tiles = fewer steps).
    b8 = pl.cdiv(B, SUBLANE) * SUBLANE
    tm = min(row_tile, b8)
    # v7x megacore: if everything would fit in one grid step but there is more
    # than one sublane group of rows, split into >=2 steps so both TCs work.
    if b8 > SUBLANE and (b8 // tm) < 2:
        tm = pl.cdiv(pl.cdiv(b8, 2), SUBLANE) * SUBLANE
    b_pad = pl.cdiv(b8, tm) * tm

    # Single cheap pad op: rows B -> b_pad, lanes 15 -> 16 (zero lane keeps the
    # padded w1 row irrelevant regardless of its contents).
    x_pad = jnp.pad(x.astype(jnp.float32),
                    ((0, b_pad - B), (0, IN_PAD - INPUT_SIZE)))

    out = pl.pallas_call(
        _fused_mlp_kernel,
        out_shape=jax.ShapeDtypeStruct((b_pad, OUT_PAD), jnp.float32),
        grid_spec=pltpu.PrefetchScalarGridSpec(
            num_scalar_prefetch=0,
            grid=(b_pad // tm,),
            in_specs=[
                pl.BlockSpec((tm, IN_PAD), lambda i: (i, 0)),
                pl.BlockSpec((IN_PAD, HIDDEN1), lambda i: (0, 0)),
                pl.BlockSpec((1, HIDDEN1), lambda i: (0, 0)),
                pl.BlockSpec((HIDDEN1, HIDDEN2), lambda i: (0, 0)),
                pl.BlockSpec((1, HIDDEN2), lambda i: (0, 0)),
                pl.BlockSpec((HIDDEN2, OUT_PAD), lambda i: (0, 0)),
                pl.BlockSpec((1, OUT_PAD), lambda i: (0, 0)),
            ],
            out_specs=pl.BlockSpec((tm, OUT_PAD), lambda i: (i, 0)),
        ),
        compiler_params=pltpu.CompilerParams(
            dimension_semantics=("parallel",)),
    )(x_pad, w1, b1, w2, b2, w3, b3)

    # Valid logits: drop padded rows and the single padded output lane.
    return out[:B, :NUM_CLASSES]


# ----------------------------------------------------------------------------
# Deterministic PyTorch-Linear-style init, stored directly in the (small)
# padded (in, out) layout so no per-call weight padding is needed.
# ----------------------------------------------------------------------------
def _linear_params(key, fan_in, fan_out, in_pad, out_pad):
    kw, kb = jax.random.split(key)
    scale = 1.0 / float(fan_in) ** 0.5
    w = jax.random.uniform(kw, (fan_in, fan_out), jnp.float32, -scale, scale)
    b = jax.random.uniform(kb, (1, fan_out), jnp.float32, -scale, scale)
    w_pad = jnp.zeros((in_pad, out_pad), jnp.float32).at[:fan_in, :fan_out].set(w)
    b_pad = jnp.zeros((1, out_pad), jnp.float32).at[:, :fan_out].set(b)
    return w_pad, b_pad


def init_params(key):
    k1, k2, k3 = jax.random.split(key, 3)
    w1, b1 = _linear_params(k1, INPUT_SIZE, HIDDEN1, IN_PAD, HIDDEN1)
    w2, b2 = _linear_params(k2, HIDDEN1, HIDDEN2, HIDDEN1, HIDDEN2)
    w3, b3 = _linear_params(k3, HIDDEN2, NUM_CLASSES, HIDDEN2, OUT_PAD)
    return (w1, b1, w2, b2, w3, b3)


# ----------------------------------------------------------------------------
# Pure-JAX reference (uses the valid sub-blocks of the padded params)
# ----------------------------------------------------------------------------
def mlp_reference(x, params):
    w1, b1, w2, b2, w3, b3 = params
    h = jnp.maximum(x @ w1[:INPUT_SIZE, :] + b1, 0.0)
    h = jnp.maximum(h @ w2 + b2, 0.0)
    return (h @ w3 + b3)[:, :NUM_CLASSES]


if __name__ == "__main__":
    key = jax.random.PRNGKey(0)
    k_param, k_x1, k_x2 = jax.random.split(key, 3)
    params = init_params(k_param)

    # Small latency-regime batch (single grid step).
    B = 8
    x = jax.random.normal(k_x1, (B, INPUT_SIZE), jnp.float32)
    logits = jax.block_until_ready(mlp_forward(x, params))
    assert logits.shape == (B, NUM_CLASSES) and logits.dtype == jnp.float32
    ref = mlp_reference(x, params)
    assert jnp.allclose(logits, ref, atol=1e-5, rtol=1e-5), (
        f"max abs err {float(jnp.max(jnp.abs(logits - ref)))}")

    # Larger batch: exercises row padding + the >=2-step (megacore) grid path.
    B2 = 200
    x2 = jax.random.normal(k_x2, (B2, INPUT_SIZE), jnp.float32)
    logits2 = jax.block_until_ready(mlp_forward(x2, params))
    ref2 = mlp_reference(x2, params)
    assert logits2.shape == (B2, NUM_CLASSES)
    assert jnp.allclose(logits2, ref2, atol=1e-5, rtol=1e-5), (
        f"max abs err {float(jnp.max(jnp.abs(logits2 - ref2)))}")

    print("KERNEL_OK")
</pallas_src>

<mosaic_0001>
module attributes {stable_mosaic.version = 11 : i64} {
  func.func @_fused_mlp_kernel(%arg0: i32, %arg1: memref<8x16xf32, #tpu.memory_space<vmem>>, %arg2: memref<16x128xf32, #tpu.memory_space<vmem>>, %arg3: memref<1x128xf32, #tpu.memory_space<vmem>>, %arg4: memref<128x64xf32, #tpu.memory_space<vmem>>, %arg5: memref<1x64xf32, #tpu.memory_space<vmem>>, %arg6: memref<64x8xf32, #tpu.memory_space<vmem>>, %arg7: memref<1x8xf32, #tpu.memory_space<vmem>>, %arg8: memref<8x8xf32, #tpu.memory_space<vmem>>) attributes {dimension_semantics = [#tpu.dimension_semantics<parallel>], iteration_bounds = array<i64: 1>, scalar_prefetch = 0 : i64, scratch_operands = 0 : i64, tpu.core_type = #tpu.core_type<tc>, window_params = [{transform_indices = @transform_0, window_bounds = array<i64: 8, 16>}, {pipeline_mode = #tpu.pipeline_mode<synchronous>, transform_indices = @transform_1, window_bounds = array<i64: 16, 128>}, {pipeline_mode = #tpu.pipeline_mode<synchronous>, transform_indices = @transform_2, window_bounds = array<i64: 1, 128>}, {pipeline_mode = #tpu.pipeline_mode<synchronous>, transform_indices = @transform_3, window_bounds = array<i64: 128, 64>}, {pipeline_mode = #tpu.pipeline_mode<synchronous>, transform_indices = @transform_4, window_bounds = array<i64: 1, 64>}, {pipeline_mode = #tpu.pipeline_mode<synchronous>, transform_indices = @transform_5, window_bounds = array<i64: 64, 8>}, {pipeline_mode = #tpu.pipeline_mode<synchronous>, transform_indices = @transform_6, window_bounds = array<i64: 1, 8>}, {transform_indices = @transform_7, window_bounds = array<i64: 8, 8>}]} {
    %c0 = arith.constant 0 : index
    %c0_0 = arith.constant 0 : index
    %0 = vector.load %arg1[%c0, %c0_0] : memref<8x16xf32, #tpu.memory_space<vmem>>, vector<8x16xf32>
    %c0_1 = arith.constant 0 : index
    %c0_2 = arith.constant 0 : index
    %1 = vector.load %arg2[%c0_1, %c0_2] : memref<16x128xf32, #tpu.memory_space<vmem>>, vector<16x128xf32>
    %cst = arith.constant dense<0.000000e+00> : vector<8x128xf32>
    %2 = tpu.matmul %0, %1, %cst {dimension_numbers = #tpu.dot_dimension_numbers<[1], [0], [0], [1], [0, 0, 1, 1], [], []>} : vector<8x16xf32>, vector<16x128xf32>, vector<8x128xf32> -> vector<8x128xf32>
    %c0_3 = arith.constant 0 : index
    %c0_4 = arith.constant 0 : index
    %3 = vector.load %arg3[%c0_3, %c0_4] : memref<1x128xf32, #tpu.memory_space<vmem>>, vector<1x128xf32>
    %4 = vector.broadcast %3 : vector<1x128xf32> to vector<8x128xf32>
    %5 = arith.addf %2, %4 : vector<8x128xf32>
    %cst_5 = arith.constant 0.000000e+00 : f32
    %6 = vector.broadcast %cst_5 : f32 to vector<8x128xf32>
    %7 = arith.maximumf %5, %6 : vector<8x128xf32>
    %c0_6 = arith.constant 0 : index
    %c0_7 = arith.constant 0 : index
    %8 = vector.load %arg4[%c0_6, %c0_7] : memref<128x64xf32, #tpu.memory_space<vmem>>, vector<128x64xf32>
    %cst_8 = arith.constant dense<0.000000e+00> : vector<8x64xf32>
    %9 = tpu.matmul %7, %8, %cst_8 {dimension_numbers = #tpu.dot_dimension_numbers<[1], [0], [0], [1], [0, 0, 1, 1], [], []>} : vector<8x128xf32>, vector<128x64xf32>, vector<8x64xf32> -> vector<8x64xf32>
    %c0_9 = arith.constant 0 : index
    %c0_10 = arith.constant 0 : index
    %10 = vector.load %arg5[%c0_9, %c0_10] : memref<1x64xf32, #tpu.memory_space<vmem>>, vector<1x64xf32>
    %11 = vector.broadcast %10 : vector<1x64xf32> to vector<8x64xf32>
    %12 = arith.addf %9, %11 : vector<8x64xf32>
    %cst_11 = arith.constant 0.000000e+00 : f32
    %13 = vector.broadcast %cst_11 : f32 to vector<8x64xf32>
    %14 = arith.maximumf %12, %13 : vector<8x64xf32>
    %c0_12 = arith.constant 0 : index
    %c0_13 = arith.constant 0 : index
    %15 = vector.load %arg6[%c0_12, %c0_13] : memref<64x8xf32, #tpu.memory_space<vmem>>, vector<64x8xf32>
    %cst_14 = arith.constant dense<0.000000e+00> : vector<8x8xf32>
    %16 = tpu.matmul %14, %15, %cst_14 {dimension_numbers = #tpu.dot_dimension_numbers<[1], [0], [0], [1], [0, 0, 1, 1], [], []>} : vector<8x64xf32>, vector<64x8xf32>, vector<8x8xf32> -> vector<8x8xf32>
    %c0_15 = arith.constant 0 : index
    %c0_16 = arith.constant 0 : index
    %17 = vector.load %arg7[%c0_15, %c0_16] : memref<1x8xf32, #tpu.memory_space<vmem>>, vector<1x8xf32>
    %18 = vector.broadcast %17 : vector<1x8xf32> to vector<8x8xf32>
    %19 = arith.addf %16, %18 : vector<8x8xf32>
    %c0_17 = arith.constant 0 : index
    %c0_18 = arith.constant 0 : index
    %20 = vector.load %arg8[%c0_17, %c0_18] : memref<8x8xf32, #tpu.memory_space<vmem>>, vector<8x8xf32>
    tpu.vector_store %arg8[%c0_17, %c0_18], %19 {strides = array<i32>} : memref<8x8xf32, #tpu.memory_space<vmem>>, vector<8x8xf32>,
    return
  }
  func.func @transform_0(%arg0: i32) -> (i32, i32) {
    %c0_i32 = arith.constant 0 : i32
    %c0_i32_0 = arith.constant 0 : i32
    return %arg0, %c0_i32 : i32, i32
  }
  func.func @transform_1(%arg0: i32) -> (i32, i32) {
    %c0_i32 = arith.constant 0 : i32
    %c0_i32_0 = arith.constant 0 : i32
    %c0_i32_1 = arith.constant 0 : i32
    return %c0_i32, %c0_i32_0 : i32, i32
  }
  func.func @transform_2(%arg0: i32) -> (i32, i32) {
    %c0_i32 = arith.constant 0 : i32
    %c0_i32_0 = arith.constant 0 : i32
    %c0_i32_1 = arith.constant 0 : i32
    return %c0_i32, %c0_i32_0 : i32, i32
  }
  func.func @transform_3(%arg0: i32) -> (i32, i32) {
    %c0_i32 = arith.constant 0 : i32
    %c0_i32_0 = arith.constant 0 : i32
    %c0_i32_1 = arith.constant 0 : i32
    return %c0_i32, %c0_i32_0 : i32, i32
  }
  func.func @transform_4(%arg0: i32) -> (i32, i32) {
    %c0_i32 = arith.constant 0 : i32
    %c0_i32_0 = arith.constant 0 : i32
    %c0_i32_1 = arith.constant 0 : i32
    return %c0_i32, %c0_i32_0 : i32, i32
  }
  func.func @transform_5(%arg0: i32) -> (i32, i32) {
    %c0_i32 = arith.constant 0 : i32
    %c0_i32_0 = arith.constant 0 : i32
    %c0_i32_1 = arith.constant 0 : i32
    return %c0_i32, %c0_i32_0 : i32, i32
  }
  func.func @transform_6(%arg0: i32) -> (i32, i32) {
    %c0_i32 = arith.constant 0 : i32
    %c0_i32_0 = arith.constant 0 : i32
    %c0_i32_1 = arith.constant 0 : i32
    return %c0_i32, %c0_i32_0 : i32, i32
  }
  func.func @transform_7(%arg0: i32) -> (i32, i32) {
    %c0_i32 = arith.constant 0 : i32
    %c0_i32_0 = arith.constant 0 : i32
    return %arg0, %c0_i32 : i32, i32
  }
}

</mosaic_0001>

<bundles_post_ra>
// kernel: tpu_custom_call.1
= control target key start
LH: loop header
LB: loop body
LE: loop exit
PB: predicated region body
PF: predicated region fallthrough
CT: control target
= control target key end

     0   :  { %v473_v2 = vmov 0.0|0.0   ;;  %vm474_vm0 = vmmov 0   ;;  %v475_v4 = vmov 0.0   ;;  %vm37_vm1 = vcmask 130048   ;;  %s635_s0 = inlined_call_operand.vmem [shape: f32[8,16], index: 0, kind: input, shape index: {}]   ;;  %s636_s1 = inlined_call_operand.vmem [shape: f32[16,128], index: 1, kind: input, shape index: {}]   ;;  %s637_s2 = inlined_call_operand.vmem [shape: f32[1,128], index: 2, kind: input, shape index: {}]   ;;  %s638_s3 = inlined_call_operand.vmem [shape: f32[128,64], index: 3, kind: input, shape index: {}]   ;;  %s639_s4 = inlined_call_operand.vmem [shape: f32[1,64], index: 4, kind: input, shape index: {}]   ;;  %s640_s5 = inlined_call_operand.vmem [shape: f32[64,8], index: 5, kind: input, shape index: {}]   ;;  %s641_s6 = inlined_call_operand.vmem [shape: f32[1,8], index: 6, kind: input, shape index: {}]   ;;  %s642_s7 = inlined_call_operand.hbm [shape: f32[8,8], index: 7, kind: output, shape index: {}]  }
   0x1   :  { %v28_v0 = vld [vmem:[%s636_s1] sm:$0xff]  ;;  %v29_v1 = vld [vmem:[%s636_s1 + $0x8] sm:$0xff]  ;;  %406 = vmatprep.subr.bf16.mxu0 %v473_v2  ;;  %349 = vmatprep.mubr.msk.f32.mxu0 %vm474_vm0, %v475_v4  ;;  %v114_v7 = vld [vmem:[%s638_s3 + $0x10] sm:$0xff] }
   0x2   :  { %v407_v3 = vpack.c.bf16 %v29_v1, %v28_v0  ;;  %v112_v5 = vld [vmem:[%s638_s3] sm:$0xff]  ;;  %v113_v6 = vld [vmem:[%s638_s3 + $0x8] sm:$0xff]  ;;  %409 = vmatprep.subr.bf16.mxu1 %v473_v2  ;;  %v115_v9 = vld [vmem:[%s638_s3 + $0x18] sm:$0xff]  ;;  %384 = vmatprep.mubr.msk.f32.mxu1 %vm474_vm0, %v475_v4 }
   0x3   :  { %v410_v8 = vpack.c.bf16 %v113_v6, %v112_v5  ;;  %v27_v10 = vld [vmem:[%s635_s0] sm:$0xff]  ;;  %v413_v11 = vpack.c.bf16 %v115_v9, %v114_v7  ;;  %v117_v13 = vld [vmem:[%s638_s3 + $0x28] sm:$0xff] }
   0x4   :  { %408 = vmatpush3.bf16.msra.mxu0 %v407_v3  ;;  %v116_v12 = vld [vmem:[%s638_s3 + $0x20] sm:$0xff] }
   0x5   :  { %411 = vmatpush3.bf16.msra.mxu1 %v410_v8  ;;  %433 = vmatprep.subr.bf16.mxu0 %v473_v2 }
   0x6   :  { %412 = vmatprep.subr.bf16.mxu1 %v473_v2 }
   0x7   :  { %350 = vmatmul.mubr.msk.f32.vlgmr.msra.gmra.mrb[0].mxu0 %vm37_vm1, %v27_v10 }
   0x8   :  { %12 = vsyncpa [#allocation3], 0  ;;  %403 = vmatprep.mubr.msk.f32.mxu0 %vm474_vm0, %v475_v4  ;;  %v416_v14 = vpack.c.bf16 %v117_v13, %v116_v12  ;;  %v118_v15 = vld [vmem:[%s638_s3 + $0x30] sm:$0xff]  ;;  %v119_v16 = vld [vmem:[%s638_s3 + $0x38] sm:$0xff]  ;;  %vm221_vm2 = vcmask 523264   ;;  %s476_s9 = smov [#allocation2]  }
   0x9   :  { %414 = vmatpush3.bf16.msra.mxu1 %v413_v11  ;;  %v419_v17 = vpack.c.bf16 %v119_v16, %v118_v15  ;;  %v120_v18 = vld [vmem:[%s638_s3 + $0x40] sm:$0xff]  ;;  %v121_v19 = vld [vmem:[%s638_s3 + $0x48] sm:$0xff]  ;;  %v122_v21 = vld [vmem:[%s638_s3 + $0x50] sm:$0xff]  ;;  %s303_s10 = sshll.u32 %s476_s9, 4  ;;  %vm295_vm3 = vcmask 64512   ;;  %s304_s10 = int_to_ptr.vmem [resolvable:$true] %s303_s10 }
   0xa   :  { %415 = vmatprep.subr.bf16.mxu1 %v473_v2  ;;  %v422_v20 = vpack.c.bf16 %v121_v19, %v120_v18  ;;  %v123_v22 = vld [vmem:[%s638_s3 + $0x58] sm:$0xff]  ;;  %v124_v24 = vld [vmem:[%s638_s3 + $0x60] sm:$0xff]  ;;  %v125_v25 = vld [vmem:[%s638_s3 + $0x68] sm:$0xff]  ;;  %p454_p1 = scmp.lt.s32.totalorder %s304_s10, %s304_s10 }
   0xb   :  { %v425_v23 = vpack.c.bf16 %v123_v22, %v122_v21  ;;  %v428_v26 = vpack.c.bf16 %v125_v25, %v124_v24  ;;  %v126_v27 = vld [vmem:[%s638_s3 + $0x70] sm:$0xff]  ;;  %v127_v28 = vld [vmem:[%s638_s3 + $0x78] sm:$0xff]  ;;  %v206_v30 = vld [vmem:[%s640_s5] sm:$0xff] }
   0xc   :  { %v431_v29 = vpack.c.bf16 %v127_v28, %v126_v27  ;;  %v207_v31 = vld [vmem:[%s640_s5 + $0x8] sm:$0xff]  ;;  %v208_v32 = vld [vmem:[%s640_s5 + $0x10] sm:$0xff]  ;;  %v209_v34 = vld [vmem:[%s640_s5 + $0x18] sm:$0xff] }
   0xd   :  { %417 = vmatpush3.bf16.msra.mxu1 %v416_v14  ;;  %v434_v33 = vpack.c.bf16 %v207_v31, %v206_v30  ;;  %v437_v35 = vpack.c.bf16 %v209_v34, %v208_v32  ;;  %v210_v36 = vld [vmem:[%s640_s5 + $0x20] sm:$0xff]  ;;  %v211_v37 = vld [vmem:[%s640_s5 + $0x28] sm:$0xff]  ;;  %v212_v44 = vld [vmem:[%s640_s5 + $0x30] sm:$0xff] }
   0xe   :  { %418 = vmatprep.subr.bf16.mxu1 %v473_v2  ;;  %v440_v38 = vpack.c.bf16 %v211_v37, %v210_v36  ;;  %v311_v39 = vld [vmem:[%s637_s2] ss:$0 sm:$0xff]  ;;  %v213_v45 = vld [vmem:[%s640_s5 + $0x38] sm:$0xff]  ;;  %s449_s5 = scalar_lea.vmem %s304_s10, 128 }
   0xf   :  { %435 = vmatpush3.bf16.msra.mxu0 %v434_v33  ;;  %v443_v46 = vpack.c.bf16 %v213_v45, %v212_v44  ;;  %v313_v47 = vld [vmem:[%s639_s4] ss:$0 sm:$0xff]  ;;  %p450_p0 = scmp.ne.s32.totalorder %s304_s10, %s449_s5  ;;  %p455_p2 = scmp.lt.s32.totalorder %s449_s5, %s449_s5 }
  0x10   :  { %436 = vmatprep.subr.bf16.mxu0 %v473_v2  ;;  %v314_v52 = vld [vmem:[%s641_s6] ss:$0 sm:$0xff] }
  0x11   :  { %420 = vmatpush3.bf16.msra.mxu1 %v419_v17  ;;  %p456_p3 = por %p455_p2, %p454_p1 }
  0x12   :  { %421 = vmatprep.subr.bf16.mxu1 %v473_v2 }
  0x13   :  { %438 = vmatpush3.bf16.msra.mxu0 %v437_v35  ;;  %p457_p4 = pnand %p456_p3, %p450_p0 }
  0x14   :  { %439 = vmatprep.subr.bf16.mxu0 %v473_v2 }
  0x15   :  { %423 = vmatpush3.bf16.msra.mxu1 %v422_v20 }
  0x16   :  { %424 = vmatprep.subr.bf16.mxu1 %v473_v2 }
  0x17   :  { %441 = vmatpush3.bf16.msra.mxu0 %v440_v38 }
  0x18   :  { %442 = vmatprep.subr.bf16.mxu0 %v473_v2 }
  0x19   :  { %426 = vmatpush3.bf16.msra.mxu1 %v425_v23 }
  0x1a   :  { %427 = vmatprep.subr.bf16.mxu1 %v473_v2 }
  0x1b   :  { %444 = vmatpush3.bf16.msra.mxu0 %v443_v46 }
  0x1d   :  { %429 = vmatpush3.bf16.msra.mxu1 %v428_v26 }
  0x1e   :  { %430 = vmatprep.subr.bf16.mxu1 %v473_v2 }
  0x21   :  { %432 = vmatpush3.bf16.msra.mxu1 %v431_v29 }
  0xda   :  { %v107_v40 = vpop.f32.mrb[0].mxu0 }
  0xdb   :  { %v108_v41 = vadd.f32 %v311_v39, %v107_v40  ;;  %v351_v42 = vpop.f32.mrb[1].mxu0 }
  0xdd   :  { %v111_v43 = vmax.f32 %v108_v41, 0.0 }
  0xdf   :  { %385 = vmatmul.mubr.f32.vlgmr.msra.gmra.mrb[0].mxu1 %v111_v43 }
 0x1b2   :  { %v201_v48 = vpop.f32.mrb[0].mxu1 }
 0x1b3   :  { %v202_v49 = vadd.f32 %v313_v47, %v201_v48  ;;  %v386_v50 = vpop.f32.mrb[1].mxu1 }
 0x1b5   :  { %v205_v51 = vmax.f32 %v202_v49, 0.0 }
 0x1b7   :  { %404 = vmatmul.mubr.msk.f32.vlgmr.msra.gmra.mrb[2].mxu0 %vm221_vm2, %v205_v51 }
 0x28a   :  { %v291_v53 = vpop.f32.mrb[2].mxu0 }
 0x28b   :  { %v292_v54 = vadd.f32 %v314_v52, %v291_v53  ;;  %v405_v55 = vpop.f32.mrb[3].mxu0 }
 0x28d   :  { %296 = vst.msk [vmem:[#allocation2] sm:$0xff] %vm295_vm3, %v292_v54 }
 0x28e   :  { %460 = shalt.err (!%p457_p4)
}
 0x28f   :  { %s461_s11 = scalar_lea.hbm %s642_s7, 128 }
 0x290   :  { %p462_p5 = scmp.ne.s32.totalorder %s642_s7, %s461_s11  ;;  %p465_p6 = scmp.lt.u32.totalorder %s461_s11, %s642_s7 }
 0x292   :  { %p467_p7 = pnand %p465_p6, %p462_p5 }
 0x294   :  { %470 = shalt.err (!%p467_p7)
}
 0x295   :  { %306 = dma.vmem_to_hbm [thread:$0]  %s304_s10, 128, %s642_s7, [#allocation3]  }
 0x296   :  { %471 = dma.done.wait [#allocation3], 128  }
 0x297   :  { %472 = vsyncadd [#allocation3], 4294967168 }
 0x298   :  { %310 = vsyncpa [#allocation3], 1 }

</bundles_post_ra>
